<compile_context>
chip_gen: v5e
topology: v5e:2x2
jax: 0.10.0
libtpu: 0.0.40
codegen_flags: <defaults>
</compile_context>

<pallas_src>
import math

import jax
import jax.numpy as jnp
from jax.experimental import pallas as pl
from jax.experimental.pallas import tpu as pltpu


def _linear_kernel_out_acc(x_ref, w_ref, b_ref, o_ref):
    """f32 output tile doubles as the K accumulator; bias folded into k==0 init."""
    @pl.when(pl.program_id(2) == 0)
    def _init():
        o_ref[...] = jnp.broadcast_to(b_ref[...].astype(jnp.float32), o_ref.shape)

    o_ref[...] += jnp.dot(x_ref[...], w_ref[...], preferred_element_type=jnp.float32)


def _linear_kernel_scratch_acc(x_ref, w_ref, b_ref, o_ref, acc_ref):
    """Low-precision outputs: accumulate in an f32 scratch, cast at the last k."""
    k = pl.program_id(2)

    @pl.when(k == 0)
    def _init():
        acc_ref[...] = jnp.broadcast_to(b_ref[...].astype(jnp.float32), acc_ref.shape)

    acc_ref[...] += jnp.dot(x_ref[...], w_ref[...], preferred_element_type=jnp.float32)

    @pl.when(k == pl.num_programs(2) - 1)
    def _fin():
        o_ref[...] = acc_ref[...].astype(o_ref.dtype)


def _round_up(x, m):
    return x + (-x) % m


def _vmem_limit_bytes(required_bytes):
    """Generation-aware VMEM limit: enough for our buffers + headroom, but never
    most of physical VMEM (v7x has only 64 MiB/TC; don't starve XLA fusions)."""
    try:
        phys = int(pltpu.get_tpu_info().vmem_capacity_bytes)
    except Exception:  # interpret mode / older runtimes: assume smallest (v7x)
        phys = 64 * 1024 * 1024
    want = int(required_bytes * 1.25) + (4 << 20)      # Mosaic internal scratch etc.
    limit = min(max(want, 16 << 20), (phys * 3) // 4)  # leave room for neighbours
    return max(limit, required_bytes + (2 << 20))      # never under-provision ourselves


def linear_layer(x, w, b, *, tm=512, tn=512, tk=1024, use_bf16_operands=False):
    """y = x @ w + b via a tiled Pallas TPU matmul kernel.

    Grid is (M/tm, N/tn, K/tk) with K innermost ("arbitrary"); the output block
    index is k-invariant, so the output tile stays VMEM-resident across the
    whole reduction.  Ragged M / N rely on Pallas' masked boundary blocks (no
    wrapper-side padding); only a large non-256-aligned K zero-pads (both
    operands, so OOB tails cannot corrupt valid outputs).
    """
    M, K = x.shape
    Kw, N = w.shape
    assert K == Kw and b.shape == (N,)
    out_dtype = x.dtype

    # Effective tiles: full extent for small dims, aligned tiles otherwise.
    tm_e = M if M <= tm else tm          # tm multiple of 8
    tn_e = N if N <= tn else tn          # tn multiple of 128 (>=256 keeps vst lane-dense)
    tk_e = K if K <= tk else tk          # tk multiple of 256

    # K tail must be genuinely zero (garbage in K multiplies into every valid
    # output element) -> rare large-ragged-K fallback zero-pads BOTH operands.
    Kp = K
    if K % tk_e != 0:
        Kp = _round_up(K, tk_e)
        x = jnp.pad(x, ((0, 0), (0, Kp - K)))
        w = jnp.pad(w, ((0, Kp - K), (0, 0)))

    gm, gn, gk = pl.cdiv(M, tm_e), pl.cdiv(N, tn_e), Kp // tk_e

    # Megacore (v7x, 2 TCs): if everything landed in a single output block but
    # there is real compute, split M so both cores get a "parallel" block.
    if gm * gn == 1 and M > 8 and 2 * M * N * K >= (1 << 26):
        tm_e = max(8, _round_up((M + 1) // 2, 8))
        gm = pl.cdiv(M, tm_e)

    # Optional bf16 MXU path (f32 accumulation is preserved in-kernel).
    if use_bf16_operands:
        x = x.astype(jnp.bfloat16)
        w = w.astype(jnp.bfloat16)

    b2 = b.reshape(1, N)                 # lane-dense (1, N) bias slab

    # Deeper buffering on BOTH K-streamed operands once the reduction loop is
    # long enough for a third buffer to hide HBM latency spikes.
    deep = {"pipeline_mode": pl.Buffered(3)} if gk >= 3 else {}
    x_spec = pl.BlockSpec((tm_e, tk_e), lambda i, j, k: (i, k), **deep)
    w_spec = pl.BlockSpec((tk_e, tn_e), lambda i, j, k: (k, j), **deep)
    # Bias block index is k-invariant, so it is only re-fetched when j changes
    # (gn fetches per i, ~KBs total) -- no per-step DMA descriptor.
    b_spec = pl.BlockSpec((1, tn_e), lambda i, j, k: (0, j))
    o_spec = pl.BlockSpec((tm_e, tn_e), lambda i, j, k: (i, j))

    xb = jnp.dtype(x.dtype).itemsize
    wb = jnp.dtype(w.dtype).itemsize
    ob = jnp.dtype(out_dtype).itemsize
    bb = jnp.dtype(b.dtype).itemsize

    if out_dtype == jnp.float32:
        kernel, scratch, acc_bytes = _linear_kernel_out_acc, [], 0
    else:
        # Low-precision inputs: keep the K reduction in an f32 scratch.
        kernel = _linear_kernel_scratch_acc
        scratch = [pltpu.VMEM((tm_e, tn_e), jnp.float32)]
        acc_bytes = tm_e * tn_e * 4

    nbuf = 3 if gk >= 3 else 2
    buf_bytes = (nbuf * tm_e * tk_e * xb + nbuf * tk_e * tn_e * wb
                 + 2 * tm_e * tn_e * ob + 2 * tn_e * bb + acc_bytes)

    cost = pl.CostEstimate(
        flops=2 * M * N * K,
        transcendentals=0,
        # Account for the gn x re-read of x and gm x re-read of W.
        bytes_accessed=int(M * Kp * xb * gn + Kp * N * wb * gm + M * N * ob + N * bb),
    )

    return pl.pallas_call(
        kernel,
        out_shape=jax.ShapeDtypeStruct((M, N), out_dtype),
        grid_spec=pltpu.PrefetchScalarGridSpec(
            num_scalar_prefetch=0,
            grid=(gm, gn, gk),
            in_specs=[x_spec, w_spec, b_spec],
            out_specs=o_spec,
            scratch_shapes=scratch,
        ),
        compiler_params=pltpu.CompilerParams(
            dimension_semantics=("parallel", "parallel", "arbitrary"),
            vmem_limit_bytes=_vmem_limit_bytes(buf_bytes),
        ),
        cost_estimate=cost,
    )(x, w, b2)


def init_linear_params(key, input_dim, units, dtype=jnp.float32):
    # Matches torch.nn.init.uniform_(w, +-sqrt(6/(in+out))) / zeros_(b).
    limit = math.sqrt(6.0 / (input_dim + units))
    w = jax.random.uniform(key, (input_dim, units), dtype=dtype,
                           minval=-limit, maxval=limit)
    b = jnp.zeros((units,), dtype=dtype)
    return w, b


if __name__ == "__main__":
    key = jax.random.PRNGKey(0)
    keys = jax.random.split(key, 12)

    # Case 1: small shapes consistent with the module (batch, input_dim, units).
    batch, input_dim, units = 8, 32, 64
    x = jax.random.normal(keys[0], (batch, input_dim), dtype=jnp.float32)
    w, b = init_linear_params(keys[1], input_dim, units)
    b = jax.random.normal(keys[2], (units,), dtype=jnp.float32)  # nonzero bias path
    y = jax.block_until_ready(linear_layer(x, w, b))
    assert y.shape == (batch, units)
    assert jnp.allclose(y, x @ w + b, atol=1e-5, rtol=1e-5)

    # Case 2: ragged M/K/N, all smaller than a tile -> full-extent blocks, no padding.
    M2, K2, N2 = 37, 50, 70
    x2 = jax.random.normal(keys[3], (M2, K2), dtype=jnp.float32)
    w2, _ = init_linear_params(keys[4], K2, N2)
    b2 = jax.random.normal(keys[5], (N2,), dtype=jnp.float32)
    y2 = jax.block_until_ready(linear_layer(x2, w2, b2))
    assert y2.shape == (M2, N2)
    assert jnp.allclose(y2, x2 @ w2 + b2, atol=1e-5, rtol=1e-5)

    # Case 3: M and N larger than a tile and non-divisible -> masked boundary
    # blocks instead of wrapper-side jnp.pad copies.
    M3, K3, N3 = 600, 100, 600
    x3 = jax.random.normal(keys[6], (M3, K3), dtype=jnp.float32)
    w3, _ = init_linear_params(keys[7], K3, N3)
    b3 = jax.random.normal(keys[8], (N3,), dtype=jnp.float32)
    y3 = jax.block_until_ready(linear_layer(x3, w3, b3))
    assert y3.shape == (M3, N3)
    assert jnp.allclose(y3, x3 @ w3 + b3, atol=1e-4, rtol=1e-4)

    # Case 4: deep ragged K -> K zero-pad fallback + Buffered(3) on x and W.
    M4, K4, N4 = 16, 2100, 128
    x4 = jax.random.normal(keys[9], (M4, K4), dtype=jnp.float32)
    w4, _ = init_linear_params(keys[10], K4, N4)
    b4 = jax.random.normal(keys[11], (N4,), dtype=jnp.float32)
    y4 = jax.block_until_ready(linear_layer(x4, w4, b4))
    assert y4.shape == (M4, N4)
    assert jnp.allclose(y4, x4 @ w4 + b4, atol=1e-3, rtol=1e-3)

    # Case 5: opt-in bf16-operand MXU path (f32 accumulation), looser tolerance.
    y5 = jax.block_until_ready(linear_layer(x, w, b, use_bf16_operands=True))
    assert jnp.allclose(y5, x @ w + b, atol=1e-1, rtol=5e-2)

    # Case 6: fully bf16 layer (d_type=bfloat16) -> f32 scratch-accumulator path.
    xb16, wb16, bb16 = x.astype(jnp.bfloat16), w.astype(jnp.bfloat16), b.astype(jnp.bfloat16)
    y6 = jax.block_until_ready(linear_layer(xb16, wb16, bb16))
    assert y6.dtype == jnp.bfloat16
    assert jnp.allclose(y6.astype(jnp.float32), x @ w + b, atol=1e-1, rtol=1e-1)

    print("KERNEL_OK")
</pallas_src>

<mosaic_0001>
module attributes {stable_mosaic.version = 11 : i64} {
  func.func @_linear_kernel_out_acc(%arg0: i32, %arg1: i32, %arg2: i32, %arg3: memref<8x32xf32, #tpu.memory_space<vmem>>, %arg4: memref<32x64xf32, #tpu.memory_space<vmem>>, %arg5: memref<1x64xf32, #tpu.memory_space<vmem>>, %arg6: memref<8x64xf32, #tpu.memory_space<vmem>>) attributes {dimension_semantics = [#tpu.dimension_semantics<parallel>, #tpu.dimension_semantics<parallel>, #tpu.dimension_semantics<arbitrary>], iteration_bounds = array<i64: 1, 1, 1>, scalar_prefetch = 0 : i64, scratch_operands = 0 : i64, tpu.core_type = #tpu.core_type<tc>, window_params = [{transform_indices = @transform_0, window_bounds = array<i64: 8, 32>}, {transform_indices = @transform_1, window_bounds = array<i64: 32, 64>}, {transform_indices = @transform_2, window_bounds = array<i64: 1, 64>}, {transform_indices = @transform_3, window_bounds = array<i64: 8, 64>}]} {
    %c0_i32 = arith.constant 0 : i32
    %0 = arith.cmpi eq, %arg2, %c0_i32 : i32
    %1 = arith.extui %0 : i1 to i32
    %c0_i32_0 = arith.constant 0 : i32
    %2 = arith.cmpi ne, %1, %c0_i32_0 : i32
    scf.if %2 {
      %c0_8 = arith.constant 0 : index
      %c0_9 = arith.constant 0 : index
      %9 = vector.load %arg5[%c0_8, %c0_9] : memref<1x64xf32, #tpu.memory_space<vmem>>, vector<1x64xf32>
      %10 = vector.shape_cast %9 : vector<1x64xf32> to vector<1x64xf32>
      %11 = vector.broadcast %10 : vector<1x64xf32> to vector<8x64xf32>
      %c0_10 = arith.constant 0 : index
      %c0_11 = arith.constant 0 : index
      %12 = vector.load %arg6[%c0_10, %c0_11] : memref<8x64xf32, #tpu.memory_space<vmem>>, vector<8x64xf32>
      tpu.vector_store %arg6[%c0_10, %c0_11], %11 {strides = array<i32>} : memref<8x64xf32, #tpu.memory_space<vmem>>, vector<8x64xf32>,
    } else {
    }
    %c0 = arith.constant 0 : index
    %c0_1 = arith.constant 0 : index
    %3 = vector.load %arg6[%c0, %c0_1] : memref<8x64xf32, #tpu.memory_space<vmem>>, vector<8x64xf32>
    %c0_2 = arith.constant 0 : index
    %c0_3 = arith.constant 0 : index
    %4 = vector.load %arg3[%c0_2, %c0_3] : memref<8x32xf32, #tpu.memory_space<vmem>>, vector<8x32xf32>
    %c0_4 = arith.constant 0 : index
    %c0_5 = arith.constant 0 : index
    %5 = vector.load %arg4[%c0_4, %c0_5] : memref<32x64xf32, #tpu.memory_space<vmem>>, vector<32x64xf32>
    %cst = arith.constant dense<0.000000e+00> : vector<8x64xf32>
    %6 = tpu.matmul %4, %5, %cst {dimension_numbers = #tpu.dot_dimension_numbers<[1], [0], [0], [1], [0, 0, 1, 1], [], []>} : vector<8x32xf32>, vector<32x64xf32>, vector<8x64xf32> -> vector<8x64xf32>
    %7 = arith.addf %3, %6 : vector<8x64xf32>
    %c0_6 = arith.constant 0 : index
    %c0_7 = arith.constant 0 : index
    %8 = vector.load %arg6[%c0_6, %c0_7] : memref<8x64xf32, #tpu.memory_space<vmem>>, vector<8x64xf32>
    tpu.vector_store %arg6[%c0_6, %c0_7], %7 {strides = array<i32>} : memref<8x64xf32, #tpu.memory_space<vmem>>, vector<8x64xf32>,
    return
  }
  func.func @transform_0(%arg0: i32, %arg1: i32, %arg2: i32) -> (i32, i32) {
    %c0_i32 = arith.constant 0 : i32
    return %arg0, %arg2 : i32, i32
  }
  func.func @transform_1(%arg0: i32, %arg1: i32, %arg2: i32) -> (i32, i32) {
    %c0_i32 = arith.constant 0 : i32
    return %arg2, %arg1 : i32, i32
  }
  func.func @transform_2(%arg0: i32, %arg1: i32, %arg2: i32) -> (i32, i32) {
    %c0_i32 = arith.constant 0 : i32
    %c0_i32_0 = arith.constant 0 : i32
    return %c0_i32, %arg1 : i32, i32
  }
  func.func @transform_3(%arg0: i32, %arg1: i32, %arg2: i32) -> (i32, i32) {
    %c0_i32 = arith.constant 0 : i32
    return %arg0, %arg1 : i32, i32
  }
}

</mosaic_0001>

<bundles_post_ra>
// kernel: tpu_custom_call.1
= control target key start
LH: loop header
LB: loop body
LE: loop exit
PB: predicated region body
PF: predicated region fallthrough
CT: control target
= control target key end

     0   :  { %8 = vsyncpa [#allocation3], 0  ;;  %s230_s0 = inlined_call_operand.hbm [shape: f32[8,32], index: 0, kind: input, shape index: {}]   ;;  %s231_s1 = inlined_call_operand.hbm [shape: f32[32,64], index: 1, kind: input, shape index: {}]   ;;  %s232_s2 = inlined_call_operand.vmem [shape: f32[1,64], index: 2, kind: input, shape index: {}]   ;;  %s233_s3 = inlined_call_operand.hbm [shape: f32[8,64], index: 3, kind: output, shape index: {}]  }
   0x1   :  { %9 = vsyncpa [#allocation6], 0 }
   0x2   :  { %10 = vsyncpa [#allocation4], 0  ;;  %s16_s14 = sshll.u32 %s230_s0, 4  ;;  %s191_s15 = smov [#allocation2]   ;;  %s17_s14 = int_to_ptr.hbm [resolvable:$true] %s16_s14 }
   0x3   :  { %s18_s16 = sshll.u32 %s191_s15, 4  ;;  %s26_s19 = sshll.u32 %s231_s1, 4  ;;  %s19_s16 = int_to_ptr.vmem [resolvable:$true] %s18_s16  ;;  %s27_s19 = int_to_ptr.hbm [resolvable:$true] %s26_s19 }
   0x4   :  { %21 = dma.hbm_to_vmem [thread:$0]  %s17_s14, 128, %s19_s16, [#allocation3]  }
   0x5   :  { %s192_s20 = smov [#allocation5]   ;;  %s193_s22 = smov 128  }
   0x6   :  { %s28_s21 = sshll.u32 %s192_s20, 4  ;;  %s194_s23 = smov 8   ;;  %s29_s21 = int_to_ptr.vmem [resolvable:$true] %s28_s21 }
   0x7   :  { %34 = dma.hbm_to_vmem [thread:$0]  %s27_s19, 512, %s29_s21, [#allocation6], %s193_s22, %s193_s22, %s194_s23  }
   0x8   :  { %185 = dma.done.wait [#allocation3], 128  }
   0x9   :  { %186 = vsyncadd [#allocation3], 4294967168 }
   0xa   :  { %187 = dma.done.wait [#allocation6], 512  }
   0xb   :  { %188 = vsyncadd [#allocation6], 4294966784  ;;  %vm53_vm0 = vcmask 523264   ;;  %v112_v0 = vld [vmem:[%s232_s2] ss:$0 sm:$0xff]  ;;  %v59_v2 = vld [vmem:[#allocation5 + $0x10] sm:$0xff] }
   0xc   :  { %v60_v1 = vld [vmem:[#allocation5 + $0x18] sm:$0xff]  ;;  %54 = vst.msk [vmem:[#allocation7] sm:$0xff] %vm53_vm0, %v112_v0  ;;  %v58_v3 = vld [vmem:[#allocation5 + $0x8] sm:$0xff]  ;;  %v57_v4 = vld [vmem:[#allocation5] sm:$0xff]  ;;  %vm61_vm1 = vcmask 261120   ;;  %s195_s1 = smov [#allocation7]  }
   0xd   :  { %77 = vmatpush.msra.mxu0 %v60_v1  ;;  %v56_v5 = vld [vmem:[#allocation2] sm:$0xff]  ;;  %s93_s25 = sshll.u32 %s195_s1, 4  ;;  %s95_s2 = sshll.u32 %s233_s3, 4  ;;  %s94_s25 = int_to_ptr.vmem [resolvable:$true] %s93_s25  ;;  %s96_s2 = int_to_ptr.hbm [resolvable:$true] %s95_s2 }
   0xf   :  { %78 = vmatpush.msra.mxu0 %v59_v2 }
  0x11   :  { %79 = vmatpush.msra.mxu0 %v58_v3 }
  0x13   :  { %80 = vmatpush.msra.mxu0 %v57_v4  ;;  %v55_v6 = vld [vmem:[#allocation7] sm:$0xff] }
  0x14   :  { %106 = vmatmul.msk.f32.vlgmr.msra.gmra.mxu0 %vm61_vm1, %v56_v5 }
  0x91   :  { %v82_v7 = vpop.f32.mrf.mxu0 }
  0x92   :  { %v85_v8 = vadd.f32 %v82_v7, %v55_v6 }
  0x94   :  { %87 = vst.msk [vmem:[#allocation7] sm:$0xff] %vm53_vm0, %v85_v8 }
  0x95   :  { %98 = dma.vmem_to_hbm [thread:$0]  %s94_s25, 128, %s96_s2, [#allocation4]  }
  0x96   :  { %189 = dma.done.wait [#allocation4], 128  }
  0x97   :  { %190 = vsyncadd [#allocation4], 4294967168 }
  0x98   :  { %103 = vsyncpa [#allocation3], 1 }
  0x99   :  { %104 = vsyncpa [#allocation6], 1 }
  0x9a   :  { %105 = vsyncpa [#allocation4], 1 }

</bundles_post_ra>
